<compile_context>
chip_gen: v6e
topology: v6e:2x2x1
jax: 0.10.0
libtpu: 0.0.40
codegen_flags: <defaults>
</compile_context>

<pallas_src>
import functools

import numpy as np
import jax
import jax.numpy as jnp
from jax.experimental import pallas as pl
from jax.experimental.pallas import tpu as pltpu


def _rot_roots(x, shift):
    """Rotate along the root (sublane) axis by a static shift."""
    return jnp.concatenate([x[shift:], x[:shift]], axis=0)


def _root_pol_kernel(a_ref, zr0_ref, zi0_ref, re_ref, im_ref, *, n_iter):
    m, bt = re_ref.shape                         # (roots, batch-lanes)

    # Monic coefficients c_i = a_i / a_0 (i = 1..M): loaded and sublane-
    # broadcast ONCE per tile, then kept vreg-resident across the iteration
    # loop (no loads inside the serial Horner chain).
    inv_a0 = 1.0 / a_ref[pl.ds(0, 1), :]                     # (1, bt)
    hoist_full = m <= 16                                     # vreg-pressure guard
    coefs = []
    for i in range(m):
        ci = a_ref[pl.ds(1 + i, 1), :] * inv_a0              # (1, bt)
        coefs.append(jnp.broadcast_to(ci, (m, bt)) if hoist_full else ci)

    # Durand-Kerner seeds (0.4+0.9j)^k, batch-invariant -> lane broadcast.
    zr = jnp.broadcast_to(zr0_ref[...], (m, bt))
    zi = jnp.broadcast_to(zi0_ref[...], (m, bt))

    def body(_, carry):
        zr, zi = carry

        # p(z) = z^M + c1 z^{M-1} + ... + cM  (complex Horner, first step peeled:
        # pr*1 - pi*0 terms dropped).
        pr = zr + coefs[0]
        pi = zi
        for i in range(1, m):
            pr, pi = pr * zr - pi * zi + coefs[i], pr * zi + pi * zr

        if m >= 2:
            # q_k = prod_{j != k} (z_k - z_j) via sublane rotations; first
            # factor peeled (multiply against 1+0j dropped).
            qr = zr - _rot_roots(zr, 1)
            qi = zi - _rot_roots(zi, 1)
            for s in range(2, m):
                dr = zr - _rot_roots(zr, s)
                di = zi - _rot_roots(zi, s)
                qr, qi = qr * dr - qi * di, qr * di + qi * dr

            # z <- z - p / q  (complex division, exact f32 reciprocal).
            inv = 1.0 / (qr * qr + qi * qi + 1e-30)
            wr = (pr * qr + pi * qi) * inv
            wi = (pi * qr - pr * qi) * inv
        else:
            # M == 1: single root, q == 1, update is just -p.
            wr, wi = pr, pi

        return zr - wr, zi - wi

    zr, zi = jax.lax.fori_loop(0, n_iter, body, (zr, zi))
    re_ref[...] = zr
    im_ref[...] = zi


class PolynomialToRoots:
    """JAX/Pallas port of diffsptk.PolynomialToRoots."""

    def __init__(self, order, out_format='rectangular', n_iter=32):
        assert 1 <= order
        self.order = order
        self.n_iter = n_iter
        if out_format in (0, 'rectangular'):
            self.formatter = lambda x: x
        elif out_format in (1, 'polar'):
            self.formatter = lambda x: (jnp.abs(x) + 1j * jnp.angle(x)).astype(jnp.complex64)
        else:
            raise ValueError(f'out_format {out_format} is not supported.')
        # companion-matrix identity block from the reference module (unused by
        # the Durand-Kerner iteration; kept for interface fidelity).
        self.eye = jnp.eye(max(order - 1, 0), order, dtype=jnp.float32)
        # deterministic Durand-Kerner seeds (0.4+0.9j)^k, k=1..M, as a column.
        z0 = (0.4 + 0.9j) ** np.arange(1, order + 1)
        self._zr0 = jnp.asarray(z0.real.reshape(order, 1), dtype=jnp.float32)
        self._zi0 = jnp.asarray(z0.imag.reshape(order, 1), dtype=jnp.float32)

    def __call__(self, a):
        assert a.shape[-1] == self.order + 1, 'order of polynomial is wrong'
        # jit/vmap-safe leading-coefficient check (only runs when concrete).
        try:
            if bool(jnp.any(a[..., 0] == 0)):
                raise RuntimeError('Leading coefficient must be non-zero.')
        except jax.errors.ConcretizationTypeError:
            pass  # skipped under tracing

        m = self.order
        batch_shape = a.shape[:-1]
        a2 = jnp.reshape(a, (-1, m + 1)).astype(jnp.float32)
        b = a2.shape[0]

        # Batch on the lane (last) axis: operate on (M+1, B) tiles.
        a_t = a2.T                                           # (M+1, B)

        # ---- lane-tile selection --------------------------------------------
        sub_tiles = -(-m // 8)                               # sublane groups per array
        lane_tiles = -(-b // 128)                            # 128-lane tiles in batch
        # vreg budget: (m hoisted coef broadcasts + ~12 temps), each using
        # sub_tiles * (bt/128) vregs; keep well under the 64-vreg file.
        bt = 128
        for cand in (512, 256):
            if (m + 12) * sub_tiles * (cand // 128) <= 48:
                bt = cand
                break
        bt = min(bt, lane_tiles * 128)                       # don't exceed batch
        if lane_tiles >= 2:
            # v7x megacore: ensure >= 2 grid steps across the parallel axis.
            bt = min(bt, -(-lane_tiles // 2) * 128)
        bt = max(bt, 128)
        b_pad = -(-b // bt) * bt
        if b_pad != b:
            # edge-replicate: padded columns are valid, well-behaved systems.
            a_t = jnp.pad(a_t, ((0, 0), (0, b_pad - b)), mode='edge')

        kernel = functools.partial(_root_pol_kernel, n_iter=self.n_iter)
        re_t, im_t = pl.pallas_call(
            kernel,
            out_shape=(
                jax.ShapeDtypeStruct((m, b_pad), jnp.float32),
                jax.ShapeDtypeStruct((m, b_pad), jnp.float32),
            ),
            grid=(b_pad // bt,),
            in_specs=[
                pl.BlockSpec((m + 1, bt), lambda i: (0, i)),
                pl.BlockSpec((m, 1), lambda i: (0, 0)),
                pl.BlockSpec((m, 1), lambda i: (0, 0)),
            ],
            out_specs=(
                pl.BlockSpec((m, bt), lambda i: (0, i)),
                pl.BlockSpec((m, bt), lambda i: (0, i)),
            ),
            compiler_params=pltpu.CompilerParams(
                dimension_semantics=("parallel",)),
        )(a_t, self._zr0, self._zi0)

        x = (re_t[:, :b].T + 1j * im_t[:, :b].T).astype(jnp.complex64)
        x = jnp.reshape(x, batch_shape + (m,))
        return self.formatter(x)


if __name__ == "__main__":
    key = jax.random.PRNGKey(0)
    batch, order = 2, 8                      # a: (2, 9) -> roots: (2, 8)
    a = jax.random.normal(key, (batch, order + 1), dtype=jnp.float32)
    # guarantee a non-zero leading coefficient
    a = a.at[..., 0].set(jnp.abs(a[..., 0]) + 1.0)

    root_pol = PolynomialToRoots(order, out_format='rectangular')
    roots = jax.block_until_ready(root_pol(a))

    # sanity check: evaluate the polynomial at the computed roots
    a_np = np.asarray(a, dtype=np.float64)
    r_np = np.asarray(roots).astype(np.complex128)
    max_resid = 0.0
    for bi in range(batch):
        for r in r_np[bi]:
            max_resid = max(max_resid, abs(np.polyval(a_np[bi], r)))
    assert max_resid < 1e-2, f"residual too large: {max_resid}"

    print("KERNEL_OK")
</pallas_src>

<mosaic_0001>
module attributes {stable_mosaic.version = 11 : i64} {
  func.func @_root_pol_kernel(%arg0: i32, %arg1: memref<9x128xf32, #tpu.memory_space<vmem>>, %arg2: memref<8x1xf32, #tpu.memory_space<vmem>>, %arg3: memref<8x1xf32, #tpu.memory_space<vmem>>, %arg4: memref<8x128xf32, #tpu.memory_space<vmem>>, %arg5: memref<8x128xf32, #tpu.memory_space<vmem>>) attributes {dimension_semantics = [#tpu.dimension_semantics<parallel>], iteration_bounds = array<i64: 1>, scalar_prefetch = 0 : i64, scratch_operands = 0 : i64, tpu.core_type = #tpu.core_type<tc>, window_params = [{transform_indices = @transform_0, window_bounds = array<i64: 9, 128>}, {pipeline_mode = #tpu.pipeline_mode<synchronous>, transform_indices = @transform_1, window_bounds = array<i64: 8, 1>}, {pipeline_mode = #tpu.pipeline_mode<synchronous>, transform_indices = @transform_2, window_bounds = array<i64: 8, 1>}, {transform_indices = @transform_3, window_bounds = array<i64: 8, 128>}, {transform_indices = @transform_4, window_bounds = array<i64: 8, 128>}]} {
    %c0 = arith.constant 0 : index
    %c0_0 = arith.constant 0 : index
    %0 = vector.load %arg1[%c0, %c0_0] : memref<9x128xf32, #tpu.memory_space<vmem>>, vector<1x128xf32>
    %cst = arith.constant 1.000000e+00 : f32
    %1 = vector.broadcast %cst : f32 to vector<1x128xf32>
    %2 = arith.divf %1, %0 : vector<1x128xf32>
    %c1 = arith.constant 1 : index
    %c0_1 = arith.constant 0 : index
    %3 = vector.load %arg1[%c1, %c0_1] : memref<9x128xf32, #tpu.memory_space<vmem>>, vector<1x128xf32>
    %4 = arith.mulf %3, %2 : vector<1x128xf32>
    %5 = vector.shape_cast %4 : vector<1x128xf32> to vector<1x128xf32>
    %6 = vector.broadcast %5 : vector<1x128xf32> to vector<8x128xf32>
    %c2 = arith.constant 2 : index
    %c0_2 = arith.constant 0 : index
    %7 = vector.load %arg1[%c2, %c0_2] : memref<9x128xf32, #tpu.memory_space<vmem>>, vector<1x128xf32>
    %8 = arith.mulf %7, %2 : vector<1x128xf32>
    %9 = vector.shape_cast %8 : vector<1x128xf32> to vector<1x128xf32>
    %10 = vector.broadcast %9 : vector<1x128xf32> to vector<8x128xf32>
    %c3 = arith.constant 3 : index
    %c0_3 = arith.constant 0 : index
    %11 = vector.load %arg1[%c3, %c0_3] : memref<9x128xf32, #tpu.memory_space<vmem>>, vector<1x128xf32>
    %12 = arith.mulf %11, %2 : vector<1x128xf32>
    %13 = vector.shape_cast %12 : vector<1x128xf32> to vector<1x128xf32>
    %14 = vector.broadcast %13 : vector<1x128xf32> to vector<8x128xf32>
    %c4 = arith.constant 4 : index
    %c0_4 = arith.constant 0 : index
    %15 = vector.load %arg1[%c4, %c0_4] : memref<9x128xf32, #tpu.memory_space<vmem>>, vector<1x128xf32>
    %16 = arith.mulf %15, %2 : vector<1x128xf32>
    %17 = vector.shape_cast %16 : vector<1x128xf32> to vector<1x128xf32>
    %18 = vector.broadcast %17 : vector<1x128xf32> to vector<8x128xf32>
    %c5 = arith.constant 5 : index
    %c0_5 = arith.constant 0 : index
    %19 = vector.load %arg1[%c5, %c0_5] : memref<9x128xf32, #tpu.memory_space<vmem>>, vector<1x128xf32>
    %20 = arith.mulf %19, %2 : vector<1x128xf32>
    %21 = vector.shape_cast %20 : vector<1x128xf32> to vector<1x128xf32>
    %22 = vector.broadcast %21 : vector<1x128xf32> to vector<8x128xf32>
    %c6 = arith.constant 6 : index
    %c0_6 = arith.constant 0 : index
    %23 = vector.load %arg1[%c6, %c0_6] : memref<9x128xf32, #tpu.memory_space<vmem>>, vector<1x128xf32>
    %24 = arith.mulf %23, %2 : vector<1x128xf32>
    %25 = vector.shape_cast %24 : vector<1x128xf32> to vector<1x128xf32>
    %26 = vector.broadcast %25 : vector<1x128xf32> to vector<8x128xf32>
    %c7 = arith.constant 7 : index
    %c0_7 = arith.constant 0 : index
    %27 = vector.load %arg1[%c7, %c0_7] : memref<9x128xf32, #tpu.memory_space<vmem>>, vector<1x128xf32>
    %28 = arith.mulf %27, %2 : vector<1x128xf32>
    %29 = vector.shape_cast %28 : vector<1x128xf32> to vector<1x128xf32>
    %30 = vector.broadcast %29 : vector<1x128xf32> to vector<8x128xf32>
    %c8 = arith.constant 8 : index
    %c0_8 = arith.constant 0 : index
    %31 = vector.load %arg1[%c8, %c0_8] : memref<9x128xf32, #tpu.memory_space<vmem>>, vector<1x128xf32>
    %32 = arith.mulf %31, %2 : vector<1x128xf32>
    %33 = vector.shape_cast %32 : vector<1x128xf32> to vector<1x128xf32>
    %34 = vector.broadcast %33 : vector<1x128xf32> to vector<8x128xf32>
    %c0_9 = arith.constant 0 : index
    %c0_10 = arith.constant 0 : index
    %35 = vector.load %arg2[%c0_9, %c0_10] : memref<8x1xf32, #tpu.memory_space<vmem>>, vector<8x1xf32>
    %36 = vector.shape_cast %35 : vector<8x1xf32> to vector<8x1xf32>
    %37 = vector.broadcast %36 : vector<8x1xf32> to vector<8x128xf32>
    %c0_11 = arith.constant 0 : index
    %c0_12 = arith.constant 0 : index
    %38 = vector.load %arg3[%c0_11, %c0_12] : memref<8x1xf32, #tpu.memory_space<vmem>>, vector<8x1xf32>
    %39 = vector.shape_cast %38 : vector<8x1xf32> to vector<8x1xf32>
    %40 = vector.broadcast %39 : vector<8x1xf32> to vector<8x128xf32>
    %c0_i32 = arith.constant 0 : i32
    %c32_i32 = arith.constant 32 : i32
    %41 = arith.addi %c0_i32, %c32_i32 : i32
    %c1_i32 = arith.constant 1 : i32
    %42:2 = scf.for %arg6 = %c0_i32 to %41 step %c1_i32 iter_args(%arg7 = %37, %arg8 = %40) -> (vector<8x128xf32>, vector<8x128xf32>)  : i32 {
      %45 = arith.addf %arg7, %6 : vector<8x128xf32>
      %46 = arith.mulf %45, %arg7 : vector<8x128xf32>
      %47 = arith.mulf %arg8, %arg8 : vector<8x128xf32>
      %48 = arith.subf %46, %47 : vector<8x128xf32>
      %49 = arith.addf %48, %10 : vector<8x128xf32>
      %50 = arith.mulf %45, %arg8 : vector<8x128xf32>
      %51 = arith.mulf %arg8, %arg7 : vector<8x128xf32>
      %52 = arith.addf %50, %51 : vector<8x128xf32>
      %53 = arith.mulf %49, %arg7 : vector<8x128xf32>
      %54 = arith.mulf %52, %arg8 : vector<8x128xf32>
      %55 = arith.subf %53, %54 : vector<8x128xf32>
      %56 = arith.addf %55, %14 : vector<8x128xf32>
      %57 = arith.mulf %49, %arg8 : vector<8x128xf32>
      %58 = arith.mulf %52, %arg7 : vector<8x128xf32>
      %59 = arith.addf %57, %58 : vector<8x128xf32>
      %60 = arith.mulf %56, %arg7 : vector<8x128xf32>
      %61 = arith.mulf %59, %arg8 : vector<8x128xf32>
      %62 = arith.subf %60, %61 : vector<8x128xf32>
      %63 = arith.addf %62, %18 : vector<8x128xf32>
      %64 = arith.mulf %56, %arg8 : vector<8x128xf32>
      %65 = arith.mulf %59, %arg7 : vector<8x128xf32>
      %66 = arith.addf %64, %65 : vector<8x128xf32>
      %67 = arith.mulf %63, %arg7 : vector<8x128xf32>
      %68 = arith.mulf %66, %arg8 : vector<8x128xf32>
      %69 = arith.subf %67, %68 : vector<8x128xf32>
      %70 = arith.addf %69, %22 : vector<8x128xf32>
      %71 = arith.mulf %63, %arg8 : vector<8x128xf32>
      %72 = arith.mulf %66, %arg7 : vector<8x128xf32>
      %73 = arith.addf %71, %72 : vector<8x128xf32>
      %74 = arith.mulf %70, %arg7 : vector<8x128xf32>
      %75 = arith.mulf %73, %arg8 : vector<8x128xf32>
      %76 = arith.subf %74, %75 : vector<8x128xf32>
      %77 = arith.addf %76, %26 : vector<8x128xf32>
      %78 = arith.mulf %70, %arg8 : vector<8x128xf32>
      %79 = arith.mulf %73, %arg7 : vector<8x128xf32>
      %80 = arith.addf %78, %79 : vector<8x128xf32>
      %81 = arith.mulf %77, %arg7 : vector<8x128xf32>
      %82 = arith.mulf %80, %arg8 : vector<8x128xf32>
      %83 = arith.subf %81, %82 : vector<8x128xf32>
      %84 = arith.addf %83, %30 : vector<8x128xf32>
      %85 = arith.mulf %77, %arg8 : vector<8x128xf32>
      %86 = arith.mulf %80, %arg7 : vector<8x128xf32>
      %87 = arith.addf %85, %86 : vector<8x128xf32>
      %88 = arith.mulf %84, %arg7 : vector<8x128xf32>
      %89 = arith.mulf %87, %arg8 : vector<8x128xf32>
      %90 = arith.subf %88, %89 : vector<8x128xf32>
      %91 = arith.addf %90, %34 : vector<8x128xf32>
      %92 = arith.mulf %84, %arg8 : vector<8x128xf32>
      %93 = arith.mulf %87, %arg7 : vector<8x128xf32>
      %94 = arith.addf %92, %93 : vector<8x128xf32>
      %95 = vector.extract_strided_slice %arg7 {offsets = [1, 0], sizes = [7, 128], strides = [1, 1]} : vector<8x128xf32> to vector<7x128xf32>
      %96 = vector.extract_strided_slice %arg7 {offsets = [0, 0], sizes = [1, 128], strides = [1, 1]} : vector<8x128xf32> to vector<1x128xf32>
      %97 = tpu.concatenate %95, %96 in 0 : vector<7x128xf32>, vector<1x128xf32> -> vector<8x128xf32>
      %98 = arith.subf %arg7, %97 : vector<8x128xf32>
      %99 = vector.extract_strided_slice %arg8 {offsets = [1, 0], sizes = [7, 128], strides = [1, 1]} : vector<8x128xf32> to vector<7x128xf32>
      %100 = vector.extract_strided_slice %arg8 {offsets = [0, 0], sizes = [1, 128], strides = [1, 1]} : vector<8x128xf32> to vector<1x128xf32>
      %101 = tpu.concatenate %99, %100 in 0 : vector<7x128xf32>, vector<1x128xf32> -> vector<8x128xf32>
      %102 = arith.subf %arg8, %101 : vector<8x128xf32>
      %103 = vector.extract_strided_slice %arg7 {offsets = [2, 0], sizes = [6, 128], strides = [1, 1]} : vector<8x128xf32> to vector<6x128xf32>
      %104 = vector.extract_strided_slice %arg7 {offsets = [0, 0], sizes = [2, 128], strides = [1, 1]} : vector<8x128xf32> to vector<2x128xf32>
      %105 = tpu.concatenate %103, %104 in 0 : vector<6x128xf32>, vector<2x128xf32> -> vector<8x128xf32>
      %106 = arith.subf %arg7, %105 : vector<8x128xf32>
      %107 = vector.extract_strided_slice %arg8 {offsets = [2, 0], sizes = [6, 128], strides = [1, 1]} : vector<8x128xf32> to vector<6x128xf32>
      %108 = vector.extract_strided_slice %arg8 {offsets = [0, 0], sizes = [2, 128], strides = [1, 1]} : vector<8x128xf32> to vector<2x128xf32>
      %109 = tpu.concatenate %107, %108 in 0 : vector<6x128xf32>, vector<2x128xf32> -> vector<8x128xf32>
      %110 = arith.subf %arg8, %109 : vector<8x128xf32>
      %111 = arith.mulf %98, %106 : vector<8x128xf32>
      %112 = arith.mulf %102, %110 : vector<8x128xf32>
      %113 = arith.subf %111, %112 : vector<8x128xf32>
      %114 = arith.mulf %98, %110 : vector<8x128xf32>
      %115 = arith.mulf %102, %106 : vector<8x128xf32>
      %116 = arith.addf %114, %115 : vector<8x128xf32>
      %117 = vector.extract_strided_slice %arg7 {offsets = [3, 0], sizes = [5, 128], strides = [1, 1]} : vector<8x128xf32> to vector<5x128xf32>
      %118 = vector.extract_strided_slice %arg7 {offsets = [0, 0], sizes = [3, 128], strides = [1, 1]} : vector<8x128xf32> to vector<3x128xf32>
      %119 = tpu.concatenate %117, %118 in 0 : vector<5x128xf32>, vector<3x128xf32> -> vector<8x128xf32>
      %120 = arith.subf %arg7, %119 : vector<8x128xf32>
      %121 = vector.extract_strided_slice %arg8 {offsets = [3, 0], sizes = [5, 128], strides = [1, 1]} : vector<8x128xf32> to vector<5x128xf32>
      %122 = vector.extract_strided_slice %arg8 {offsets = [0, 0], sizes = [3, 128], strides = [1, 1]} : vector<8x128xf32> to vector<3x128xf32>
      %123 = tpu.concatenate %121, %122 in 0 : vector<5x128xf32>, vector<3x128xf32> -> vector<8x128xf32>
      %124 = arith.subf %arg8, %123 : vector<8x128xf32>
      %125 = arith.mulf %113, %120 : vector<8x128xf32>
      %126 = arith.mulf %116, %124 : vector<8x128xf32>
      %127 = arith.subf %125, %126 : vector<8x128xf32>
      %128 = arith.mulf %113, %124 : vector<8x128xf32>
      %129 = arith.mulf %116, %120 : vector<8x128xf32>
      %130 = arith.addf %128, %129 : vector<8x128xf32>
      %131 = vector.extract_strided_slice %arg7 {offsets = [4, 0], sizes = [4, 128], strides = [1, 1]} : vector<8x128xf32> to vector<4x128xf32>
      %132 = vector.extract_strided_slice %arg7 {offsets = [0, 0], sizes = [4, 128], strides = [1, 1]} : vector<8x128xf32> to vector<4x128xf32>
      %133 = tpu.concatenate %131, %132 in 0 : vector<4x128xf32>, vector<4x128xf32> -> vector<8x128xf32>
      %134 = arith.subf %arg7, %133 : vector<8x128xf32>
      %135 = vector.extract_strided_slice %arg8 {offsets = [4, 0], sizes = [4, 128], strides = [1, 1]} : vector<8x128xf32> to vector<4x128xf32>
      %136 = vector.extract_strided_slice %arg8 {offsets = [0, 0], sizes = [4, 128], strides = [1, 1]} : vector<8x128xf32> to vector<4x128xf32>
      %137 = tpu.concatenate %135, %136 in 0 : vector<4x128xf32>, vector<4x128xf32> -> vector<8x128xf32>
      %138 = arith.subf %arg8, %137 : vector<8x128xf32>
      %139 = arith.mulf %127, %134 : vector<8x128xf32>
      %140 = arith.mulf %130, %138 : vector<8x128xf32>
      %141 = arith.subf %139, %140 : vector<8x128xf32>
      %142 = arith.mulf %127, %138 : vector<8x128xf32>
      %143 = arith.mulf %130, %134 : vector<8x128xf32>
      %144 = arith.addf %142, %143 : vector<8x128xf32>
      %145 = vector.extract_strided_slice %arg7 {offsets = [5, 0], sizes = [3, 128], strides = [1, 1]} : vector<8x128xf32> to vector<3x128xf32>
      %146 = vector.extract_strided_slice %arg7 {offsets = [0, 0], sizes = [5, 128], strides = [1, 1]} : vector<8x128xf32> to vector<5x128xf32>
      %147 = tpu.concatenate %145, %146 in 0 : vector<3x128xf32>, vector<5x128xf32> -> vector<8x128xf32>
      %148 = arith.subf %arg7, %147 : vector<8x128xf32>
      %149 = vector.extract_strided_slice %arg8 {offsets = [5, 0], sizes = [3, 128], strides = [1, 1]} : vector<8x128xf32> to vector<3x128xf32>
      %150 = vector.extract_strided_slice %arg8 {offsets = [0, 0], sizes = [5, 128], strides = [1, 1]} : vector<8x128xf32> to vector<5x128xf32>
      %151 = tpu.concatenate %149, %150 in 0 : vector<3x128xf32>, vector<5x128xf32> -> vector<8x128xf32>
      %152 = arith.subf %arg8, %151 : vector<8x128xf32>
      %153 = arith.mulf %141, %148 : vector<8x128xf32>
      %154 = arith.mulf %144, %152 : vector<8x128xf32>
      %155 = arith.subf %153, %154 : vector<8x128xf32>
      %156 = arith.mulf %141, %152 : vector<8x128xf32>
      %157 = arith.mulf %144, %148 : vector<8x128xf32>
      %158 = arith.addf %156, %157 : vector<8x128xf32>
      %159 = vector.extract_strided_slice %arg7 {offsets = [6, 0], sizes = [2, 128], strides = [1, 1]} : vector<8x128xf32> to vector<2x128xf32>
      %160 = vector.extract_strided_slice %arg7 {offsets = [0, 0], sizes = [6, 128], strides = [1, 1]} : vector<8x128xf32> to vector<6x128xf32>
      %161 = tpu.concatenate %159, %160 in 0 : vector<2x128xf32>, vector<6x128xf32> -> vector<8x128xf32>
      %162 = arith.subf %arg7, %161 : vector<8x128xf32>
      %163 = vector.extract_strided_slice %arg8 {offsets = [6, 0], sizes = [2, 128], strides = [1, 1]} : vector<8x128xf32> to vector<2x128xf32>
      %164 = vector.extract_strided_slice %arg8 {offsets = [0, 0], sizes = [6, 128], strides = [1, 1]} : vector<8x128xf32> to vector<6x128xf32>
      %165 = tpu.concatenate %163, %164 in 0 : vector<2x128xf32>, vector<6x128xf32> -> vector<8x128xf32>
      %166 = arith.subf %arg8, %165 : vector<8x128xf32>
      %167 = arith.mulf %155, %162 : vector<8x128xf32>
      %168 = arith.mulf %158, %166 : vector<8x128xf32>
      %169 = arith.subf %167, %168 : vector<8x128xf32>
      %170 = arith.mulf %155, %166 : vector<8x128xf32>
      %171 = arith.mulf %158, %162 : vector<8x128xf32>
      %172 = arith.addf %170, %171 : vector<8x128xf32>
      %173 = vector.extract_strided_slice %arg7 {offsets = [7, 0], sizes = [1, 128], strides = [1, 1]} : vector<8x128xf32> to vector<1x128xf32>
      %174 = vector.extract_strided_slice %arg7 {offsets = [0, 0], sizes = [7, 128], strides = [1, 1]} : vector<8x128xf32> to vector<7x128xf32>
      %175 = tpu.concatenate %173, %174 in 0 : vector<1x128xf32>, vector<7x128xf32> -> vector<8x128xf32>
      %176 = arith.subf %arg7, %175 : vector<8x128xf32>
      %177 = vector.extract_strided_slice %arg8 {offsets = [7, 0], sizes = [1, 128], strides = [1, 1]} : vector<8x128xf32> to vector<1x128xf32>
      %178 = vector.extract_strided_slice %arg8 {offsets = [0, 0], sizes = [7, 128], strides = [1, 1]} : vector<8x128xf32> to vector<7x128xf32>
      %179 = tpu.concatenate %177, %178 in 0 : vector<1x128xf32>, vector<7x128xf32> -> vector<8x128xf32>
      %180 = arith.subf %arg8, %179 : vector<8x128xf32>
      %181 = arith.mulf %169, %176 : vector<8x128xf32>
      %182 = arith.mulf %172, %180 : vector<8x128xf32>
      %183 = arith.subf %181, %182 : vector<8x128xf32>
      %184 = arith.mulf %169, %180 : vector<8x128xf32>
      %185 = arith.mulf %172, %176 : vector<8x128xf32>
      %186 = arith.addf %184, %185 : vector<8x128xf32>
      %187 = arith.mulf %183, %183 : vector<8x128xf32>
      %188 = arith.mulf %186, %186 : vector<8x128xf32>
      %189 = arith.addf %187, %188 : vector<8x128xf32>
      %cst_17 = arith.constant 1.000000e-30 : f32
      %190 = vector.broadcast %cst_17 : f32 to vector<8x128xf32>
      %191 = arith.addf %189, %190 : vector<8x128xf32>
      %cst_18 = arith.constant 1.000000e+00 : f32
      %192 = vector.broadcast %cst_18 : f32 to vector<8x128xf32>
      %193 = arith.divf %192, %191 : vector<8x128xf32>
      %194 = arith.mulf %91, %183 : vector<8x128xf32>
      %195 = arith.mulf %94, %186 : vector<8x128xf32>
      %196 = arith.addf %194, %195 : vector<8x128xf32>
      %197 = arith.mulf %196, %193 : vector<8x128xf32>
      %198 = arith.mulf %94, %183 : vector<8x128xf32>
      %199 = arith.mulf %91, %186 : vector<8x128xf32>
      %200 = arith.subf %198, %199 : vector<8x128xf32>
      %201 = arith.mulf %200, %193 : vector<8x128xf32>
      %202 = arith.subf %arg7, %197 : vector<8x128xf32>
      %203 = arith.subf %arg8, %201 : vector<8x128xf32>
      scf.yield %202, %203 : vector<8x128xf32>, vector<8x128xf32>
    }
    %c0_13 = arith.constant 0 : index
    %c0_14 = arith.constant 0 : index
    %43 = vector.load %arg4[%c0_13, %c0_14] : memref<8x128xf32, #tpu.memory_space<vmem>>, vector<8x128xf32>
    tpu.vector_store %arg4[%c0_13, %c0_14], %42#0 {strides = array<i32>} : memref<8x128xf32, #tpu.memory_space<vmem>>, vector<8x128xf32>,
    %c0_15 = arith.constant 0 : index
    %c0_16 = arith.constant 0 : index
    %44 = vector.load %arg5[%c0_15, %c0_16] : memref<8x128xf32, #tpu.memory_space<vmem>>, vector<8x128xf32>
    tpu.vector_store %arg5[%c0_15, %c0_16], %42#1 {strides = array<i32>} : memref<8x128xf32, #tpu.memory_space<vmem>>, vector<8x128xf32>,
    return
  }
  func.func @transform_0(%arg0: i32) -> (i32, i32) {
    %c0_i32 = arith.constant 0 : i32
    %c0_i32_0 = arith.constant 0 : i32
    return %c0_i32, %arg0 : i32, i32
  }
  func.func @transform_1(%arg0: i32) -> (i32, i32) {
    %c0_i32 = arith.constant 0 : i32
    %c0_i32_0 = arith.constant 0 : i32
    %c0_i32_1 = arith.constant 0 : i32
    return %c0_i32, %c0_i32_0 : i32, i32
  }
  func.func @transform_2(%arg0: i32) -> (i32, i32) {
    %c0_i32 = arith.constant 0 : i32
    %c0_i32_0 = arith.constant 0 : i32
    %c0_i32_1 = arith.constant 0 : i32
    return %c0_i32, %c0_i32_0 : i32, i32
  }
  func.func @transform_3(%arg0: i32) -> (i32, i32) {
    %c0_i32 = arith.constant 0 : i32
    %c0_i32_0 = arith.constant 0 : i32
    return %c0_i32, %arg0 : i32, i32
  }
  func.func @transform_4(%arg0: i32) -> (i32, i32) {
    %c0_i32 = arith.constant 0 : i32
    %c0_i32_0 = arith.constant 0 : i32
    return %c0_i32, %arg0 : i32, i32
  }
}

</mosaic_0001>

<bundles_post_ra>
// kernel: tpu_custom_call.1
= control target key start
LH: loop header
LB: loop body
LE: loop exit
PB: predicated region body
PF: predicated region fallthrough
CT: control target
= control target key end

     0   :  { %10 = vsyncpa [#allocation3], 0  ;;  %s605_s0 = inlined_call_operand.vmem [shape: f32[9,128], index: 0, kind: input, shape index: {}]   ;;  %s606_s1 = inlined_call_operand.vmem [shape: f32[8,1], index: 1, kind: input, shape index: {}]   ;;  %s607_s2 = inlined_call_operand.vmem [shape: f32[8,1], index: 2, kind: input, shape index: {}]   ;;  %s608_s3 = inlined_call_operand.hbm [shape: f32[8,128], index: 3, kind: output, shape index: {0}]   ;;  %s609_s4 = inlined_call_operand.hbm [shape: f32[8,128], index: 4, kind: output, shape index: {1}]  }
   0x1   :  { %v69_v0 = vld [vmem:[%s606_s1] sm:$0xff] }
   0x2   :  { %11 = vsyncpa [#allocation5], 0  ;;  %v397_v1 = vmov 0   ;;  %v18_v2 = vld [vmem:[%s605_s0] sm:$0x1]  ;;  %v23_v4 = vlaneseq }
   0x3   :  { %324 = vset.pattern.permute.xlu0 %v397_v1  ;;  %325 = vrcp.f32 %v18_v2  ;;  %v75_v3 = vld [vmem:[%s607_s2] sm:$0xff]  ;;  %v63_v14 = vld [vmem:[%s605_s0 + $0x8] sm:$0x1] }
   0x4   :  { %72 = vperm.xlu0 %324, %v69_v0   ;;  %v24_v5 = vshrl.u32 %v23_v4, 7  ;;  %v21_v6 = vld [vmem:[%s605_s0 + $0x1] sm:$0x1]  ;;  %v27_v7 = vld [vmem:[%s605_s0 + $0x2] sm:$0x1] }
   0x5   :  { %v33_v8 = vld [vmem:[%s605_s0 + $0x3] sm:$0x1]  ;;  %v39_v9 = vld [vmem:[%s605_s0 + $0x4] sm:$0x1]  ;;  %v45_v10 = vld [vmem:[%s605_s0 + $0x5] sm:$0x1] }
   0x6   :  { %v51_v11 = vld [vmem:[%s605_s0 + $0x6] sm:$0x1]  ;;  %v452_v12 = vsub.s32 0, %v24_v5  ;;  %v57_v13 = vld [vmem:[%s605_s0 + $0x7] sm:$0x1]  ;;  %s496_s0 = smov 0  }
   0x8   :  { %78 = vperm.xlu0 %324, %v75_v3  }
  0x10   :  { %v326_v15 = vpop.eup %325 }
  0x11   :  { %v460_v16 = vmul.f32 %v326_v15, %v21_v6  ;;  %v462_v17 = vmul.f32 %v326_v15, %v27_v7  ;;  %v464_v18 = vmul.f32 %v326_v15, %v33_v8  ;;  %v466_v19 = vmul.f32 %v326_v15, %v39_v9 }
  0x12   :  { %v468_v20 = vmul.f32 %v326_v15, %v45_v10  ;;  %v470_v21 = vmul.f32 %v326_v15, %v51_v11  ;;  %v472_v22 = vmul.f32 %v326_v15, %v57_v13  ;;  %v474_v23 = vmul.f32 %v326_v15, %v63_v14 }
  0x13   :  { %v26_v24 = vrot.slane %v460_v16, %v452_v12  ;;  %v32_v25 = vrot.slane %v462_v17, %v452_v12  ;;  %v38_v26 = vrot.slane %v464_v18, %v452_v12  ;;  %v44_v27 = vrot.slane %v466_v19, %v452_v12 }
  0x14   :  { %v50_v28 = vrot.slane %v468_v20, %v452_v12  ;;  %v56_v29 = vrot.slane %v470_v21, %v452_v12  ;;  %v62_v30 = vrot.slane %v472_v22, %v452_v12  ;;  %v68_v31 = vrot.slane %v474_v23, %v452_v12 }
  0x7f   :  { %v73_v32 = vpop.permute.xlu0 %72  }
  0x83   :  { %v79_v33 = vpop.permute.xlu0 %78  }
  0x84 LB: > { %v89_v34 = vadd.f32 %v391_v32, %v26_v24  ;;  %v91_v35 = vmul.f32 %v387_v33, %v387_v33  ;;  %v95_v36 = vmul.f32 %v387_v33, %v391_v32  ;;  %v140_v37 = vrot.slane %v391_v32, 1  ;;  %s86_s0 = sadd.s32 1, %s395_s0   ;;  %s395_s0 = sphi %s496_s0, %s86_s0   ;;  %v391_v32 = vphi %v73_v32, %v611_v32   ;;  %v387_v33 = vphi %v79_v33, %v610_v33  }
  0x85   : > { %v146_v38 = vrot.slane %v387_v33, 1  ;;  %v150_v39 = vrot.slane %v391_v32, 2  ;;  %v155_v40 = vrot.slane %v387_v33, 2  ;;  %v165_v41 = vrot.slane %v391_v32, 3  ;;  %p83_p0 = scmp.ge.s32.totalorder %s86_s0, 32  }
  0x86   : > { %v90_v42 = vmul.f32 %v391_v32, %v89_v34  ;;  %v94_v43 = vmul.f32 %v387_v33, %v89_v34  ;;  %v144_v44 = vsub.f32 %v391_v32, %v140_v37  ;;  %v170_v45 = vrot.slane %v387_v33, 3  ;;  %s398_s9 = smov (%p83_p0), [#allocation2]   ;;  %s399_s11 = smov (%p83_p0), [#allocation4]  }
  0x87   : > { %v149_v46 = vsub.f32 %v387_v33, %v146_v38  ;;  %v154_v47 = vsub.f32 %v391_v32, %v150_v39  ;;  %v158_v48 = vsub.f32 %v387_v33, %v155_v40  ;;  %v169_v49 = vsub.f32 %v391_v32, %v165_v41  ;;  %s264_s10 = sshll.u32 (%p83_p0), %s398_s9, 4  ;;  %s274_s12 = sshll.u32 (%p83_p0), %s399_s11, 4  ;;  %s265_s10 = int_to_ptr.vmem [resolvable:$true] %s264_s10  ;;  %s275_s12 = int_to_ptr.vmem [resolvable:$true] %s274_s12 }
  0x88   : > { %v92_v50 = vsub.f32 %v90_v42, %v91_v35  ;;  %v96_v51 = vadd.f32 %v95_v36, %v94_v43  ;;  %v173_v52 = vsub.f32 %v387_v33, %v170_v45  ;;  %v180_v53 = vrot.slane %v391_v32, 4  ;;  %s329_s13 = scalar_lea.vmem (%p83_p0), %s265_s10, 128  ;;  %p334_p2 = scmp.lt.s32.totalorder (%p83_p0), %s265_s10, %s265_s10 }
  0x89   : > { %v159_v54 = vmul.f32 %v154_v47, %v144_v44  ;;  %v160_v55 = vmul.f32 %v158_v48, %v149_v46  ;;  %v162_v56 = vmul.f32 %v158_v48, %v144_v44  ;;  %v163_v57 = vmul.f32 %v154_v47, %v149_v46  ;;  %p330_p1 = scmp.ne.s32.totalorder (%p83_p0), %s265_s10, %s329_s13  ;;  %p335_p3 = scmp.lt.s32.totalorder (%p83_p0), %s329_s13, %s329_s13 }
  0x8a   : > { %v93_v58 = vadd.f32 %v92_v50, %v32_v25  ;;  %v98_v59 = vmul.f32 %v387_v33, %v96_v51  ;;  %v102_v60 = vmul.f32 %v391_v32, %v96_v51  ;;  %v185_v63 = vrot.slane %v387_v33, 4 }
  0x8b   : > { %v161_v61 = vsub.f32 %v159_v54, %v160_v55  ;;  %v164_v62 = vadd.f32 %v163_v57, %v162_v56  ;;  %v195_v0 = vrot.slane %v391_v32, 5  ;;  %v184_v3 = vsub.f32 %v391_v32, %v180_v53  ;;  %p336_p4 = por (%p83_p0), %p335_p3, %p334_p2 }
  0x8c   : > { %v97_v1 = vmul.f32 %v391_v32, %v93_v58  ;;  %v101_v2 = vmul.f32 %v387_v33, %v93_v58  ;;  %v200_v4 = vrot.slane %v387_v33, 5  ;;  %v188_v11 = vsub.f32 %v387_v33, %v185_v63 }
  0x8d   : > { %v174_v5 = vmul.f32 %v169_v49, %v161_v61  ;;  %v175_v6 = vmul.f32 %v173_v52, %v164_v62  ;;  %v177_v7 = vmul.f32 %v173_v52, %v161_v61  ;;  %v178_v8 = vmul.f32 %v169_v49, %v164_v62  ;;  %p337_p5 = pnand (%p83_p0), %p336_p4, %p330_p1 }
  0x8e   : > { %v99_v9 = vsub.f32 %v97_v1, %v98_v59  ;;  %v103_v10 = vadd.f32 %v102_v60, %v101_v2  ;;  %v210_v13 = vrot.slane %v391_v32, 6  ;;  %v199_v34 = vsub.f32 %v391_v32, %v195_v0 }
  0x8f   : > { %v176_v14 = vsub.f32 %v174_v5, %v175_v6  ;;  %v179_v15 = vadd.f32 %v178_v8, %v177_v7  ;;  %v203_v35 = vsub.f32 %v387_v33, %v200_v4  ;;  %v215_v39 = vrot.slane %v387_v33, 6 }
  0x90   : > { %v100_v36 = vadd.f32 %v99_v9, %v38_v26  ;;  %v105_v37 = vmul.f32 %v387_v33, %v103_v10  ;;  %v109_v38 = vmul.f32 %v391_v32, %v103_v10  ;;  %v214_v48 = vsub.f32 %v391_v32, %v210_v13 }
  0x91   : > { %v189_v40 = vmul.f32 %v184_v3, %v176_v14  ;;  %v190_v41 = vmul.f32 %v188_v11, %v179_v15  ;;  %v192_v42 = vmul.f32 %v188_v11, %v176_v14  ;;  %v193_v43 = vmul.f32 %v184_v3, %v179_v15 }
  0x92   : > { %v104_v44 = vmul.f32 %v391_v32, %v100_v36  ;;  %v108_v45 = vmul.f32 %v387_v33, %v100_v36  ;;  %v218_v49 = vsub.f32 %v387_v33, %v215_v39  ;;  %v225_v52 = vrot.slane %v391_v32, 7 }
  0x93   : > { %v191_v46 = vsub.f32 %v189_v40, %v190_v41  ;;  %v194_v47 = vadd.f32 %v193_v43, %v192_v42  ;;  %v230_v53 = vrot.slane %v387_v33, 7 }
  0x94   : > { %v106_v50 = vsub.f32 %v104_v44, %v105_v37  ;;  %v110_v51 = vadd.f32 %v109_v38, %v108_v45  ;;  %v229_v1 = vsub.f32 %v391_v32, %v225_v52 }
  0x95   : > { %v204_v54 = vmul.f32 %v199_v34, %v191_v46  ;;  %v205_v55 = vmul.f32 %v203_v35, %v194_v47  ;;  %v207_v56 = vmul.f32 %v203_v35, %v191_v46  ;;  %v208_v57 = vmul.f32 %v199_v34, %v194_v47 }
  0x96   : > { %v107_v58 = vadd.f32 %v106_v50, %v44_v27  ;;  %v112_v59 = vmul.f32 %v387_v33, %v110_v51  ;;  %v116_v60 = vmul.f32 %v391_v32, %v110_v51  ;;  %v233_v2 = vsub.f32 %v387_v33, %v230_v53 }
  0x97   : > { %v206_v61 = vsub.f32 %v204_v54, %v205_v55  ;;  %v209_v62 = vadd.f32 %v208_v57, %v207_v56 }
  0x98   : > { %v111_v63 = vmul.f32 %v391_v32, %v107_v58  ;;  %v115_v0 = vmul.f32 %v387_v33, %v107_v58 }
  0x99   : > { %v219_v3 = vmul.f32 %v214_v48, %v206_v61  ;;  %v220_v4 = vmul.f32 %v218_v49, %v209_v62  ;;  %v222_v5 = vmul.f32 %v218_v49, %v206_v61  ;;  %v223_v6 = vmul.f32 %v214_v48, %v209_v62 }
  0x9a   : > { %v113_v7 = vsub.f32 %v111_v63, %v112_v59  ;;  %v117_v8 = vadd.f32 %v116_v60, %v115_v0 }
  0x9b   : > { %v221_v9 = vsub.f32 %v219_v3, %v220_v4  ;;  %v224_v10 = vadd.f32 %v223_v6, %v222_v5 }
  0x9c   : > { %v114_v11 = vadd.f32 %v113_v7, %v50_v28  ;;  %v119_v13 = vmul.f32 %v387_v33, %v117_v8  ;;  %v123_v14 = vmul.f32 %v391_v32, %v117_v8 }
  0x9d   : > { %v234_v15 = vmul.f32 %v229_v1, %v221_v9  ;;  %v235_v34 = vmul.f32 %v233_v2, %v224_v10  ;;  %v237_v35 = vmul.f32 %v233_v2, %v221_v9  ;;  %v238_v36 = vmul.f32 %v229_v1, %v224_v10 }
  0x9e   : > { %v118_v37 = vmul.f32 %v391_v32, %v114_v11  ;;  %v122_v38 = vmul.f32 %v387_v33, %v114_v11 }
  0x9f   : > { %v236_v39 = vsub.f32 %v234_v15, %v235_v34  ;;  %v239_v40 = vadd.f32 %v238_v36, %v237_v35 }
  0xa0   : > { %v120_v41 = vsub.f32 %v118_v37, %v119_v13  ;;  %v124_v42 = vadd.f32 %v123_v14, %v122_v38 }
  0xa1   : > { %v240_v43 = vmul.f32 %v236_v39, %v236_v39  ;;  %v241_v44 = vmul.f32 %v239_v40, %v239_v40 }
  0xa2   : > { %v121_v45 = vadd.f32 %v120_v41, %v56_v29  ;;  %v126_v46 = vmul.f32 %v387_v33, %v124_v42  ;;  %v130_v47 = vmul.f32 %v391_v32, %v124_v42 }
  0xa3   : > { %v242_v48 = vadd.f32 %v241_v44, %v240_v43 }
  0xa4   : > { %v125_v49 = vmul.f32 %v391_v32, %v121_v45  ;;  %v129_v50 = vmul.f32 %v387_v33, %v121_v45 }
  0xa5   : > { %v243_v51 = vadd.f32 1e-30, %v242_v48 }
  0xa6   : > { %v127_v52 = vsub.f32 %v125_v49, %v126_v46  ;;  %v131_v53 = vadd.f32 %v130_v47, %v129_v50 }
  0xa7   : > { %327 = vrcp.f32 %v243_v51 }
  0xa8   : > { %v128_v54 = vadd.f32 %v127_v52, %v62_v30  ;;  %v133_v55 = vmul.f32 %v387_v33, %v131_v53  ;;  %v137_v56 = vmul.f32 %v391_v32, %v131_v53 }
  0xaa   : > { %v132_v57 = vmul.f32 %v391_v32, %v128_v54  ;;  %v136_v58 = vmul.f32 %v387_v33, %v128_v54 }
  0xac   : > { %v134_v59 = vsub.f32 %v132_v57, %v133_v55  ;;  %v138_v60 = vadd.f32 %v137_v56, %v136_v58 }
  0xae   : > { %v135_v61 = vadd.f32 %v134_v59, %v68_v31  ;;  %v247_v62 = vmul.f32 %v239_v40, %v138_v60  ;;  %v250_v63 = vmul.f32 %v236_v39, %v138_v60 }
  0xb0   : > { %v246_v0 = vmul.f32 %v236_v39, %v135_v61  ;;  %v251_v1 = vmul.f32 %v239_v40, %v135_v61 }
  0xb2   : > { %v248_v2 = vadd.f32 %v247_v62, %v246_v0  ;;  %v252_v3 = vsub.f32 %v250_v63, %v251_v1 }
  0xb4   : > { %v328_v4 = vpop.eup %327 }
  0xb5   : > { %v249_v5 = vmul.f32 %v328_v4, %v248_v2  ;;  %v253_v6 = vmul.f32 %v328_v4, %v252_v3  ;;  %85 = sbr.rel (!%p83_p0) target bundleno = 132 (0x84), region = 47 }
  0xb7   : > { %v254_v7 = vsub.f32 %v391_v32, %v249_v5   ;;  %v255_v8 = vsub.f32 %v387_v33, %v253_v6  }
  0xb9   : > { %v610_v33 = vmov %v255_v8  ;;  %v611_v32 = vmov %v254_v7  ;;  %256 = vst [vmem:[#allocation2] sm:$0xff] (%p83_p0), %v254_v7  ;;  %257 = vst [vmem:[#allocation4] sm:$0xff] (%p83_p0), %v255_v8 }
  0xba   :  { %340 = shalt.err (!%p337_p5)
}
  0xbb   :  { %267 = dma.vmem_to_hbm [thread:$0]  %s265_s10, 128, %s608_s3, [#allocation3]  }
  0xbc   :  { %s349_s16 = scalar_lea.vmem %s275_s12, 128  ;;  %p354_p7 = scmp.lt.s32.totalorder %s275_s12, %s275_s12 }
  0xbd   :  { %p350_p6 = scmp.ne.s32.totalorder %s275_s12, %s349_s16  ;;  %p355_p8 = scmp.lt.s32.totalorder %s349_s16, %s349_s16 }
  0xbf   :  { %p356_p9 = por %p355_p8, %p354_p7 }
  0xc1   :  { %p357_p10 = pnand %p356_p9, %p350_p6 }
  0xc3   :  { %360 = shalt.err (!%p357_p10)
}
  0xc4   :  { %277 = dma.vmem_to_hbm [thread:$0]  %s275_s12, 128, %s609_s4, [#allocation5]  }
  0xc5   :  { %381 = dma.done.wait [#allocation3], 128  }
  0xc6   :  { %382 = vsyncadd [#allocation3], 4294967168 }
  0xc7   :  { %383 = dma.done.wait [#allocation5], 128  }
  0xc8   :  { %384 = vsyncadd [#allocation5], 4294967168 }
  0xc9   :  { %284 = vsyncpa [#allocation3], 1 }
  0xca   :  { %285 = vsyncpa [#allocation5], 1 }

</bundles_post_ra>
